<compile_context>
chip_gen: v7x
topology: tpu7x:2x2x1
jax: 0.10.0
libtpu: 0.0.40
codegen_flags: <defaults>
</compile_context>

<pallas_src>
import functools

import jax
import jax.numpy as jnp
from jax.experimental import pallas as pl
from jax.experimental.pallas import tpu as pltpu


# --------------------------------------------------------------------------- kernel
def _dwsep_kernel(x_ref, w_ref, out_ref, *, K, Ho, pre_gathered, compute_dtype):
    """out = sum_kh  lhs_kh @ M[kh]   (f32 accumulation on the MXU).

    x_ref:
      pre_gathered=False (stride==1): (nb, Hp, Wp*Cin)   padded rows, lanes = (w, cin)
      pre_gathered=True  (stride>1) : (K, nb*Ho, Wp*Cin) height-strided row windows
    w_ref : (K, Wp*Cin, Wo*Cout)  banded depthwise*pointwise matrices (compute dtype)
    out_ref: (nb*Ho, Wo*Cout)     lane-dense output slab
    """
    n_rows, _ = out_ref.shape
    wp_cin = x_ref.shape[-1]

    acc = jnp.zeros(out_ref.shape, jnp.float32)
    for kh in range(K):                      # K is tiny (3): fully unrolled
        if pre_gathered:
            lhs = x_ref[kh]                  # (nb*Ho, Wp*Cin)
        else:
            # One sublane-shifted row read per kh (review: 3 loads instead of 9 taps).
            lhs = x_ref[:, kh:kh + Ho, :].reshape(n_rows, wp_cin)
        acc = acc + jnp.dot(lhs.astype(compute_dtype), w_ref[kh],
                            preferred_element_type=jnp.float32)
    out_ref[...] = acc.astype(out_ref.dtype)


# ------------------------------------------------------------------ weight folding
def prepare_dwsep_weights(w_dw, w_pw, *, width, stride=1, padding=0,
                          compute_dtype=jnp.bfloat16):
    """Fold depthwise (Cin,1,K,K) + pointwise (Cout,Cin,1,1) weights into K banded
    matmul RHS matrices of shape (Wp*Cin, Wo*Cout).

    Call ONCE when weights are set (hoisted out of the per-call path, per review).
    """
    Cin = w_dw.shape[0]
    K = w_dw.shape[-1]
    Wp = width + 2 * padding
    Wo = (width + 2 * padding - K) // stride + 1

    dwk = jnp.transpose(w_dw[:, 0, :, :], (1, 2, 0))       # (K, K, Cin): [kh, kw, cin]
    pw_mat = jnp.transpose(w_pw[:, :, 0, 0], (1, 0))       # (Cin, Cout)

    w_idx = jnp.arange(Wp)[:, None]                         # (Wp, 1)
    wo_idx = jnp.arange(Wo)[None, :]                        # (1, Wo)
    kw_of = w_idx - wo_idx * stride                         # (Wp, Wo): kw = w - wo*s
    valid = (kw_of >= 0) & (kw_of < K)
    kw_cl = jnp.clip(kw_of, 0, K - 1)
    gain = dwk[:, kw_cl, :] * valid[None, :, :, None].astype(dwk.dtype)  # (K,Wp,Wo,Cin)
    M = jnp.einsum("kwoc,cd->kwcod", gain, pw_mat)          # (K, Wp, Cin, Wo, Cout)
    Cout = pw_mat.shape[1]
    return M.reshape(K, Wp * Cin, Wo * Cout).astype(compute_dtype)


# --------------------------------------------------------------------- chip query
def _tensorcores_per_chip():
    """Best-effort TensorCore-per-chip count (2 on v7x, 1 on v5e/v6e)."""
    try:
        info = pltpu.get_tpu_info()
        for attr in ("num_cores", "cores_per_chip", "num_tensorcores", "core_count"):
            v = getattr(info, attr, None)
            if v is None:
                continue
            v = int(v)
            if v > 0:
                return v
    except Exception:
        pass
    return 1


# ----------------------------------------------------------------------- wrapper
def dwsep_conv2d_prepared(x_nchw, M, *, stride=1, padding=0, batch_grid=None):
    """x_nchw: (N, Cin, H, W); M: prepared (K, Wp*Cin, Wo*Cout) banded weights."""
    N, Cin, H, W = x_nchw.shape
    K = M.shape[0]
    Hp, Wp = H + 2 * padding, W + 2 * padding
    Ho = (Hp - K) // stride + 1
    Wo = (Wp - K) // stride + 1
    assert M.shape[1] == Wp * Cin and M.shape[2] % Wo == 0, (M.shape, Wp, Cin, Wo)
    Cout = M.shape[2] // Wo
    compute_dtype = M.dtype

    # Lane-dense input slab: (w, cin) flattened onto the lane axis.
    x_nhwc = jnp.transpose(x_nchw, (0, 2, 3, 1))
    x_pad = jnp.pad(x_nhwc, ((0, 0), (padding, padding), (padding, padding), (0, 0)))

    pre_gathered = stride != 1
    if not pre_gathered:
        x_in = x_pad.reshape(N, Hp, Wp * Cin)
    else:
        # Pre-gather the K height-strided row windows in the wrapper (in-kernel strided
        # slices would materialize lane-scatter copies); width stride is absorbed by M.
        rows = [
            jax.lax.slice(x_pad, (0, kh, 0, 0),
                          (N, kh + (Ho - 1) * stride + 1, Wp, Cin),
                          (1, stride, 1, 1))
            for kh in range(K)
        ]
        x_in = jnp.stack(rows, axis=0).reshape(K, N * Ho, Wp * Cin)

    # v7x has 2 TensorCores per chip: give the grid a real parallel axis there; keep
    # the collapsed 1-step grid on single-TC chips (v5e/v6e) to avoid per-step overhead.
    if batch_grid is None:
        batch_grid = _tensorcores_per_chip() > 1
    batch_grid = bool(batch_grid) and N > 1 and (Ho % 8 == 0)

    kernel = functools.partial(_dwsep_kernel, K=K, Ho=Ho,
                               pre_gathered=pre_gathered, compute_dtype=compute_dtype)
    w_spec = pl.BlockSpec((K, Wp * Cin, Wo * Cout), lambda *_: (0, 0, 0))

    if batch_grid:
        grid = (N,)
        if pre_gathered:
            x_spec = pl.BlockSpec((K, Ho, Wp * Cin), lambda n: (0, n, 0))
        else:
            x_spec = pl.BlockSpec((1, Hp, Wp * Cin), lambda n: (n, 0, 0))
        out_spec = pl.BlockSpec((Ho, Wo * Cout), lambda n: (n, 0))
        semantics = ("parallel",)
    else:
        grid = (1,)
        if pre_gathered:
            x_spec = pl.BlockSpec((K, N * Ho, Wp * Cin), lambda i: (0, 0, 0))
        else:
            x_spec = pl.BlockSpec((N, Hp, Wp * Cin), lambda i: (0, 0, 0))
        out_spec = pl.BlockSpec((N * Ho, Wo * Cout), lambda i: (0, 0))
        semantics = ("arbitrary",)

    cost = pl.CostEstimate(
        flops=2 * K * N * Ho * (Wp * Cin) * (Wo * Cout),   # issued banded-matmul MACs
        transcendentals=0,
        bytes_accessed=(x_in.size * x_in.dtype.itemsize
                        + M.size * M.dtype.itemsize
                        + N * Ho * Wo * Cout * x_nchw.dtype.itemsize),
    )

    out_slab = pl.pallas_call(
        kernel,
        out_shape=jax.ShapeDtypeStruct((N * Ho, Wo * Cout), x_nchw.dtype),
        grid_spec=pltpu.PrefetchScalarGridSpec(
            num_scalar_prefetch=0,
            grid=grid,
            in_specs=[x_spec, w_spec],
            out_specs=out_spec,
        ),
        compiler_params=pltpu.CompilerParams(dimension_semantics=semantics),
        cost_estimate=cost,
    )(x_in, M)

    # TODO(synk): if the consumer accepts NHWC, skip this relayout (pure convention).
    return jnp.transpose(out_slab.reshape(N, Ho, Wo, Cout), (0, 3, 1, 2))


def depthwise_separable_conv2d(x_nchw, w_dw, w_pw, *, stride=1, padding=0,
                               compute_dtype=jnp.bfloat16, batch_grid=None):
    """Convenience wrapper matching the PyTorch module (prepares weights per call;
    prefer prepare_dwsep_weights() + dwsep_conv2d_prepared() in a real pipeline)."""
    M = prepare_dwsep_weights(w_dw, w_pw, width=x_nchw.shape[-1],
                              stride=stride, padding=padding,
                              compute_dtype=compute_dtype)
    return dwsep_conv2d_prepared(x_nchw, M, stride=stride, padding=padding,
                                 batch_grid=batch_grid)


# ---------------------------------------------------------------------- reference
def _reference(x_nchw, w_dw, w_pw, *, stride, padding):
    Cin = x_nchw.shape[1]
    dw = jax.lax.conv_general_dilated(
        x_nchw, w_dw, window_strides=(stride, stride),
        padding=((padding, padding), (padding, padding)),
        dimension_numbers=("NCHW", "OIHW", "NCHW"),
        feature_group_count=Cin, precision=jax.lax.Precision.HIGHEST,
    )
    return jax.lax.conv_general_dilated(
        dw, w_pw, window_strides=(1, 1), padding="VALID",
        dimension_numbers=("NCHW", "OIHW", "NCHW"),
        precision=jax.lax.Precision.HIGHEST,
    )


if __name__ == "__main__":
    # Module config: DepthwiseSeparableConv2d(in_channels=4, out_channels=8,
    #                                         kernel_size=3, stride=1, padding=1, bias=False)
    N, CIN, H, W = 2, 4, 16, 16
    COUT, K, STRIDE, PAD = 8, 3, 1, 1

    key = jax.random.PRNGKey(0)
    kx, kdw, kpw = jax.random.split(key, 3)
    x = jax.random.normal(kx, (N, CIN, H, W), dtype=jnp.float32)
    # Deterministic synthetic weights with PyTorch Conv2d shapes.
    w_dw = jax.random.normal(kdw, (CIN, 1, K, K), dtype=jnp.float32) * 0.1   # groups=Cin
    w_pw = jax.random.normal(kpw, (COUT, CIN, 1, 1), dtype=jnp.float32) * 0.1

    ref = _reference(x, w_dw, w_pw, stride=STRIDE, padding=PAD)

    # ---- 1) default path: weight prep hoisted, bf16 MXU operands, f32 accumulation ----
    M_bf16 = prepare_dwsep_weights(w_dw, w_pw, width=W, stride=STRIDE, padding=PAD,
                                   compute_dtype=jnp.bfloat16)
    conv = jax.jit(functools.partial(dwsep_conv2d_prepared, stride=STRIDE, padding=PAD))
    out = jax.block_until_ready(conv(x, M_bf16))
    assert out.shape == (N, COUT, H, W), out.shape
    # bf16 operands (f32 acc) -> relaxed tolerance vs the f32 conv reference.
    assert jnp.allclose(out, ref, atol=1e-2, rtol=1e-2), float(jnp.max(jnp.abs(out - ref)))

    # ---- 2) f32 operands + explicit batch-parallel grid (v7x-style), tight tolerance ----
    M_f32 = prepare_dwsep_weights(w_dw, w_pw, width=W, stride=STRIDE, padding=PAD,
                                  compute_dtype=jnp.float32)
    conv_par = jax.jit(functools.partial(dwsep_conv2d_prepared, stride=STRIDE,
                                         padding=PAD, batch_grid=True))
    out_f32 = jax.block_until_ready(conv_par(x, M_f32))
    assert jnp.allclose(out_f32, ref, atol=5e-4, rtol=5e-4), \
        float(jnp.max(jnp.abs(out_f32 - ref)))

    # ---- 3) stride=2 path (pre-gathered height windows), previously untested ----
    STRIDE2 = 2
    ref2 = _reference(x, w_dw, w_pw, stride=STRIDE2, padding=PAD)
    conv_s2 = jax.jit(functools.partial(depthwise_separable_conv2d, stride=STRIDE2,
                                        padding=PAD, compute_dtype=jnp.float32))
    out2 = jax.block_until_ready(conv_s2(x, w_dw, w_pw))
    assert out2.shape == ref2.shape, (out2.shape, ref2.shape)
    assert jnp.allclose(out2, ref2, atol=5e-4, rtol=5e-4), \
        float(jnp.max(jnp.abs(out2 - ref2)))

    print("KERNEL_OK")
</pallas_src>

<mosaic_0001>
module attributes {stable_mosaic.version = 11 : i64} {
  func.func @_dwsep_kernel(%arg0: i32, %arg1: memref<2x18x72xf32, #tpu.memory_space<vmem>>, %arg2: memref<3x72x128xbf16, #tpu.memory_space<vmem>>, %arg3: memref<32x128xf32, #tpu.memory_space<vmem>>) attributes {dimension_semantics = [#tpu.dimension_semantics<arbitrary>], iteration_bounds = array<i64: 1>, scalar_prefetch = 0 : i64, scratch_operands = 0 : i64, tpu.core_type = #tpu.core_type<tc>, window_params = [{pipeline_mode = #tpu.pipeline_mode<synchronous>, transform_indices = @transform_0, window_bounds = array<i64: 2, 18, 72>}, {pipeline_mode = #tpu.pipeline_mode<synchronous>, transform_indices = @transform_1, window_bounds = array<i64: 3, 72, 128>}, {pipeline_mode = #tpu.pipeline_mode<synchronous>, transform_indices = @transform_2, window_bounds = array<i64: 32, 128>}]} {
    %cst = arith.constant 0.000000e+00 : f32
    %0 = vector.broadcast %cst : f32 to vector<32x128xf32>
    %c0 = arith.constant 0 : index
    %c0_0 = arith.constant 0 : index
    %c0_1 = arith.constant 0 : index
    %1 = vector.load %arg1[%c0, %c0_0, %c0_1] : memref<2x18x72xf32, #tpu.memory_space<vmem>>, vector<2x16x72xf32>
    %2 = vector.shape_cast %1 : vector<2x16x72xf32> to vector<32x72xf32>
    %3 = arith.truncf %2 : vector<32x72xf32> to vector<32x72xbf16>
    %c0_2 = arith.constant 0 : index
    %c0_3 = arith.constant 0 : index
    %c0_4 = arith.constant 0 : index
    %4 = vector.load %arg2[%c0_2, %c0_3, %c0_4] : memref<3x72x128xbf16, #tpu.memory_space<vmem>>, vector<1x72x128xbf16>
    %5 = vector.shape_cast %4 : vector<1x72x128xbf16> to vector<72x128xbf16>
    %cst_5 = arith.constant dense<0.000000e+00> : vector<32x128xf32>
    %6 = tpu.matmul %3, %5, %cst_5 {dimension_numbers = #tpu.dot_dimension_numbers<[1], [0], [0], [1], [0, 0, 1, 1], [], []>} : vector<32x72xbf16>, vector<72x128xbf16>, vector<32x128xf32> -> vector<32x128xf32>
    %7 = arith.addf %0, %6 : vector<32x128xf32>
    %c0_6 = arith.constant 0 : index
    %c1 = arith.constant 1 : index
    %c0_7 = arith.constant 0 : index
    %8 = vector.load %arg1[%c0_6, %c1, %c0_7] : memref<2x18x72xf32, #tpu.memory_space<vmem>>, vector<2x16x72xf32>
    %9 = vector.shape_cast %8 : vector<2x16x72xf32> to vector<32x72xf32>
    %10 = arith.truncf %9 : vector<32x72xf32> to vector<32x72xbf16>
    %c1_8 = arith.constant 1 : index
    %c0_9 = arith.constant 0 : index
    %c0_10 = arith.constant 0 : index
    %11 = vector.load %arg2[%c1_8, %c0_9, %c0_10] : memref<3x72x128xbf16, #tpu.memory_space<vmem>>, vector<1x72x128xbf16>
    %12 = vector.shape_cast %11 : vector<1x72x128xbf16> to vector<72x128xbf16>
    %cst_11 = arith.constant dense<0.000000e+00> : vector<32x128xf32>
    %13 = tpu.matmul %10, %12, %cst_11 {dimension_numbers = #tpu.dot_dimension_numbers<[1], [0], [0], [1], [0, 0, 1, 1], [], []>} : vector<32x72xbf16>, vector<72x128xbf16>, vector<32x128xf32> -> vector<32x128xf32>
    %14 = arith.addf %7, %13 : vector<32x128xf32>
    %c0_12 = arith.constant 0 : index
    %c2 = arith.constant 2 : index
    %c0_13 = arith.constant 0 : index
    %15 = vector.load %arg1[%c0_12, %c2, %c0_13] : memref<2x18x72xf32, #tpu.memory_space<vmem>>, vector<2x16x72xf32>
    %16 = vector.shape_cast %15 : vector<2x16x72xf32> to vector<32x72xf32>
    %17 = arith.truncf %16 : vector<32x72xf32> to vector<32x72xbf16>
    %c2_14 = arith.constant 2 : index
    %c0_15 = arith.constant 0 : index
    %c0_16 = arith.constant 0 : index
    %18 = vector.load %arg2[%c2_14, %c0_15, %c0_16] : memref<3x72x128xbf16, #tpu.memory_space<vmem>>, vector<1x72x128xbf16>
    %19 = vector.shape_cast %18 : vector<1x72x128xbf16> to vector<72x128xbf16>
    %cst_17 = arith.constant dense<0.000000e+00> : vector<32x128xf32>
    %20 = tpu.matmul %17, %19, %cst_17 {dimension_numbers = #tpu.dot_dimension_numbers<[1], [0], [0], [1], [0, 0, 1, 1], [], []>} : vector<32x72xbf16>, vector<72x128xbf16>, vector<32x128xf32> -> vector<32x128xf32>
    %21 = arith.addf %14, %20 : vector<32x128xf32>
    %c0_18 = arith.constant 0 : index
    %c0_19 = arith.constant 0 : index
    %22 = vector.load %arg3[%c0_18, %c0_19] : memref<32x128xf32, #tpu.memory_space<vmem>>, vector<32x128xf32>
    tpu.vector_store %arg3[%c0_18, %c0_19], %21 {strides = array<i32>} : memref<32x128xf32, #tpu.memory_space<vmem>>, vector<32x128xf32>,
    return
  }
  func.func @transform_0(%arg0: i32) -> (i32, i32, i32) {
    %c0_i32 = arith.constant 0 : i32
    %c0_i32_0 = arith.constant 0 : i32
    %c0_i32_1 = arith.constant 0 : i32
    %c0_i32_2 = arith.constant 0 : i32
    return %c0_i32, %c0_i32_0, %c0_i32_1 : i32, i32, i32
  }
  func.func @transform_1(%arg0: i32) -> (i32, i32, i32) {
    %c0_i32 = arith.constant 0 : i32
    %c0_i32_0 = arith.constant 0 : i32
    %c0_i32_1 = arith.constant 0 : i32
    %c0_i32_2 = arith.constant 0 : i32
    return %c0_i32, %c0_i32_0, %c0_i32_1 : i32, i32, i32
  }
  func.func @transform_2(%arg0: i32) -> (i32, i32) {
    %c0_i32 = arith.constant 0 : i32
    %c0_i32_0 = arith.constant 0 : i32
    %c0_i32_1 = arith.constant 0 : i32
    return %c0_i32, %c0_i32_0 : i32, i32
  }
}

</mosaic_0001>

<bundles_post_ra>
// kernel: dwsep_conv2d_prepared.1
= control target key start
LH: loop header
LB: loop body
LE: loop exit
PB: predicated region body
PF: predicated region fallthrough
CT: control target
= control target key end

     0   :  { %vm70_vm0 = vcmask 588800   ;;  %vm77_vm1 = vcmask 1043456   ;;  %s576_s1 = inlined_call_operand.vmem [shape: bf16[3,72,128], index: 1, kind: input, shape index: {}]   ;;  %s577_s0 = inlined_call_operand.vmem [shape: f32[2,18,72], index: 0, kind: input, shape index: {}]   ;;  %s578_s2 = inlined_call_operand.vmem [shape: f32[32,128], index: 2, kind: output, shape index: {}]  }
   0x1   :  { %v441_v0 = vld [vmem:[%s576_s1] sm:$0xff]   ;;  %v442_v1 = vld [vmem:[%s576_s1 + $0x8] sm:$0xff]   ;;  %v443_v2 = vld [vmem:[%s576_s1 + $0x10] sm:$0xff]  }
   0x2   :  { %402 = vmatprep.subr.bf16.mxu0 %v441_v0  ;;  %v446_v3 = vld [vmem:[%s576_s1 + $0x24] sm:$0xff]   ;;  %v444_v7 = vld [vmem:[%s576_s1 + $0x18] sm:$0xff]   ;;  %v448_v8 = vld [vmem:[%s576_s1 + $0x2c] sm:$0xff]  }
   0x3   :  { %403 = vmatpush3.bf16.msra.mxu0 %v441_v0  ;;  %v12_v4 = vld [vmem:[%s577_s0] sm:$0xff]  ;;  %v13_v5 = vld [vmem:[%s577_s0 + $0x8] sm:$0xff]  ;;  %388 = vmatprep.subr.bf16.mxu1 %v446_v3  ;;  %v450_v9 = vld [vmem:[%s576_s1 + $0x34] sm:$0xff]  }
   0x4   :  { %404 = vmatprep.subr.bf16.mxu0 %v442_v1  ;;  %v16_v6 = vpack.c.bf16 %v13_v5, %v12_v4  ;;  %389 = vmatpush3.bf16.msra.mxu1 %v446_v3  ;;  %v445_v10 = vld [vmem:[%s576_s1 + $0x20] ss:$0 sps:$4 sm:$0xff]   ;;  %v14_v12 = vld [vmem:[%s577_s0 + $0x18] sm:$0xff]  ;;  %v27_v13 = vld [vmem:[%s577_s0 + $0x1] sm:$0xff] }
   0x5   :  { %390 = vmatprep.subr.bf16.mxu1 %v448_v8  ;;  %v452_v11 = vld [vmem:[%s576_s1 + $0x3c] sm:$0xff]   ;;  %v28_v15 = vld [vmem:[%s577_s0 + $0x9] sm:$0xff]  ;;  %v164_v16 = vsel %vm77_vm1, %v445_v10, 0  ;;  %v454_v20 = vld [vmem:[%s576_s1 + $0x44] ss:$0 sps:$4 sm:$0xff]  }
   0x6   :  { %412 = vmatprep.mubr.msk.bf16.mxu0 %vm70_vm0, %v16_v6  ;;  %v15_v14 = vld [vmem:[%s577_s0 + $0x20] sm:$0xff]  ;;  %v447_v17 = vld [vmem:[%s576_s1 + $0x48] sm:$0xff]   ;;  %v31_v18 = vpack.c.bf16 %v28_v15, %v27_v13  ;;  %v449_v24 = vld [vmem:[%s576_s1 + $0x50] sm:$0xff]   ;;  %v79_v27 = vsel %vm77_vm1, %v454_v20, 0 }
   0x7   :  { %405 = vmatpush3.bf16.msra.mxu0 %v442_v1  ;;  %v215_v19 = vld [vmem:[%s577_s0 + $0x2] sm:$0xff]  ;;  %v216_v21 = vld [vmem:[%s577_s0 + $0xa] sm:$0xff]  ;;  %v17_v22 = vpack.c.bf16 %v15_v14, %v14_v12  ;;  %v29_v25 = vld [vmem:[%s577_s0 + $0x19] sm:$0xff] }
   0x8   :  { %406 = vmatprep.subr.bf16.mxu0 %v443_v2  ;;  %391 = vmatpush3.bf16.msra.mxu1 %v448_v8  ;;  %v219_v23 = vpack.c.bf16 %v216_v21, %v215_v19  ;;  %v30_v26 = vld [vmem:[%s577_s0 + $0x21] sm:$0xff]  ;;  %v451_v29 = vld [vmem:[%s576_s1 + $0x58] sm:$0xff]  }
   0x9   :  { %392 = vmatprep.subr.bf16.mxu1 %v450_v9  ;;  %398 = vmatprep.mubr.msk.bf16.mxu1 %vm70_vm0, %v31_v18  ;;  %v32_v28 = vpack.c.bf16 %v30_v26, %v29_v25  ;;  %v453_v30 = vld [vmem:[%s576_s1 + $0x60] sm:$0xff]   ;;  %v455_v31 = vld [vmem:[%s576_s1 + $0x68] ss:$0 sps:$4 sm:$0xff]  }
   0xa   :  { %v217_v32 = vld [vmem:[%s577_s0 + $0x1a] sm:$0xff]  ;;  %v218_v33 = vld [vmem:[%s577_s0 + $0x22] sm:$0xff]  ;;  %v265_v34 = vsel %vm77_vm1, %v455_v31, 0 }
   0xb   :  { %407 = vmatpush3.bf16.msra.mxu0 %v443_v2  ;;  %v220_v35 = vpack.c.bf16 %v218_v33, %v217_v32 }
   0xc   :  { %408 = vmatprep.subr.bf16.mxu0 %v444_v7  ;;  %393 = vmatpush3.bf16.msra.mxu1 %v450_v9 }
   0xd   :  { %394 = vmatprep.subr.bf16.mxu1 %v452_v11 }
   0xf   :  { %409 = vmatpush3.bf16.msra.mxu0 %v444_v7 }
  0x10   :  { %439 = vmatprep.subr.msk.bf16.mxu0 %vm77_vm1, %v445_v10  ;;  %395 = vmatpush3.bf16.msra.mxu1 %v452_v11 }
  0x11   :  { %438 = vmatprep.subr.msk.bf16.mxu1 %vm77_vm1, %v454_v20 }
  0x13   :  { %411 = vmatpush3.bf16.msra.mxu0 %v164_v16 }
  0x14   :  { %416 = vmatprep.subr.bf16.mxu0 %v447_v17  ;;  %397 = vmatpush3.bf16.msra.mxu1 %v79_v27 }
  0x16   :  { %413 = vmatmul.mubr.msk.bf16.vlgmr.msra.gmra.mrb[0].mxu0 %vm70_vm0, %v17_v22 }
  0x17   :  { %417 = vmatpush3.bf16.msra.mxu0 %v447_v17  ;;  %426 = vmatprep.mubr.msk.bf16.mxu0 %vm70_vm0, %v219_v23 }
  0x18   :  { %418 = vmatprep.subr.bf16.mxu0 %v449_v24  ;;  %399 = vmatmul.mubr.msk.bf16.vlgmr.msra.gmra.mrb[0].mxu1 %vm70_vm0, %v32_v28 }
  0x1b   :  { %419 = vmatpush3.bf16.msra.mxu0 %v449_v24 }
  0x1c   :  { %420 = vmatprep.subr.bf16.mxu0 %v451_v29 }
  0x1f   :  { %421 = vmatpush3.bf16.msra.mxu0 %v451_v29 }
  0x20   :  { %422 = vmatprep.subr.bf16.mxu0 %v453_v30 }
  0x23   :  { %423 = vmatpush3.bf16.msra.mxu0 %v453_v30 }
  0x24   :  { %440 = vmatprep.subr.msk.bf16.mxu0 %vm77_vm1, %v455_v31 }
  0x27   :  { %425 = vmatpush3.bf16.msra.mxu0 %v265_v34 }
  0x2a   :  { %427 = vmatmul.mubr.msk.bf16.vlgmr.msra.gmra.mrb[0].mxu0 %vm70_vm0, %v220_v35 }
  0xeb   :  { %v400_v36 = vpop.f32.mrb[0].mxu1 }
  0xec   :  { %v115_v37 = vpop.f32.mrb[1].mxu1 }
  0xed   :  { %v401_v38 = vpop.f32.mrb[2].mxu1 }
  0xee   :  { %v118_v39 = vpop.f32.mrb[3].mxu1 }
  0xfd   :  { %v428_v40 = vpop.f32.mrb[0].mxu0 }
  0xfe   :  { %v430_v41 = vadd.f32 %v428_v40, %v400_v36  ;;  %v301_v42 = vpop.f32.mrb[1].mxu0 }
  0xff   :  { %v431_v43 = vadd.f32 %v301_v42, %v115_v37  ;;  %v429_v44 = vpop.f32.mrb[2].mxu0 }
 0x100   :  { %322 = vst [vmem:[%s578_s2 + $0x10] sm:$0xff] %v430_v41  ;;  %v432_v45 = vadd.f32 %v429_v44, %v401_v38  ;;  %v304_v46 = vpop.f32.mrb[3].mxu0 }
 0x101   :  { %320 = vst [vmem:[%s578_s2] sm:$0xff] %v431_v43  ;;  %v433_v47 = vadd.f32 %v304_v46, %v118_v39 }
 0x102   :  { %323 = vst [vmem:[%s578_s2 + $0x18] sm:$0xff] %v432_v45 }
 0x103   :  { %321 = vst [vmem:[%s578_s2 + $0x8] sm:$0xff] %v433_v47 }

</bundles_post_ra>
